<compile_context>
chip_gen: v6e
topology: v6e:2x2x1
jax: 0.10.0
libtpu: 0.0.40
codegen_flags: <defaults>
</compile_context>

<pallas_src>
import functools

import jax
import jax.numpy as jnp
from jax.experimental import pallas as pl
from jax.experimental.pallas import tpu as pltpu


def _round_up(x, m):
    return (x + m - 1) // m * m


def _mlp_kernel(num_hidden_layers, *refs):
    # refs = (x, w_embed, b_embed, [w_h_i, b_h_i] * L, w_score, out)
    x_ref = refs[0]
    w_e_ref = refs[1]
    b_e_ref = refs[2]
    hidden_refs = refs[3:3 + 2 * num_hidden_layers]
    w_s_ref = refs[3 + 2 * num_hidden_layers]
    o_ref = refs[4 + 2 * num_hidden_layers]

    # embed_net: x @ W_e + b_e   (bf16 inputs, f32 accumulation)
    h = jnp.dot(x_ref[...], w_e_ref[...], preferred_element_type=jnp.float32)
    h = h + b_e_ref[...]

    # Dropout(0.2): identity at inference time.
    # TODO(synk): training-mode dropout (stochastic masking) is not applied here.

    # hidden_layers: Linear + ReLU, repeated num_hidden_layers times.
    for i in range(num_hidden_layers):
        w_ref = hidden_refs[2 * i]
        b_ref = hidden_refs[2 * i + 1]
        h = jnp.dot(h.astype(jnp.bfloat16), w_ref[...],
                    preferred_element_type=jnp.float32) + b_ref[...]
        h = jnp.maximum(h, 0.0)

    # score_net: ReLU -> Linear(hidden, num_classes, bias=False).
    # The ReLU is redundant (idempotent) when the last hidden layer already
    # applied one, so only emit it for num_hidden_layers == 0.
    if num_hidden_layers == 0:
        h = jnp.maximum(h, 0.0)

    o_ref[...] = jnp.dot(h.astype(jnp.bfloat16), w_s_ref[...],
                         preferred_element_type=jnp.float32)


def mlp_classifier_forward(x, w_embed, b_embed, hidden_ws, hidden_bs, w_score):
    """Runs the fused, batch-tiled MLP classifier kernel.

    x: (B, ...) arbitrary trailing dims, flattened to (B, input_size)
    w_embed: (input_size, hidden);  b_embed: (1, hidden)
    hidden_ws[i]: (hidden, hidden); hidden_bs[i]: (1, hidden)
    w_score: (hidden, num_classes)
    returns: (B, num_classes) float32
    """
    B = x.shape[0]
    num_hidden_layers = len(hidden_ws)
    hidden = w_embed.shape[1]
    num_classes = w_score.shape[1]

    x2 = x.reshape(B, -1).astype(jnp.float32)
    input_size = x2.shape[1]

    # Padded sizes for (8, 128)-friendly tiles and lane-dense output stores.
    in_pad = _round_up(input_size, 128)
    cls_pad = _round_up(num_classes, 128)
    TB = min(256, _round_up(B, 8))          # batch tile (rows per grid step)
    B_pad = _round_up(B, TB)
    n_tiles = B_pad // TB

    # Zero-pad inputs / weights (zeros contribute nothing to the dots).
    x_p = jnp.pad(x2.astype(jnp.bfloat16),
                  ((0, B_pad - B), (0, in_pad - input_size)))
    w_e = jnp.pad(w_embed.astype(jnp.bfloat16),
                  ((0, in_pad - input_size), (0, 0)))
    b_e = b_embed.reshape(1, hidden).astype(jnp.float32)
    h_ws = [w.astype(jnp.bfloat16) for w in hidden_ws]
    h_bs = [b.reshape(1, hidden).astype(jnp.float32) for b in hidden_bs]
    w_s = jnp.pad(w_score.astype(jnp.bfloat16),
                  ((0, 0), (0, cls_pad - num_classes)))

    # BlockSpecs: x/out tiled over batch; all weights/biases at a constant
    # block index so they stay VMEM-resident across grid steps.
    const2 = lambda i: (0, 0)
    args = [x_p, w_e, b_e]
    in_specs = [
        pl.BlockSpec((TB, in_pad), lambda i: (i, 0)),
        pl.BlockSpec((in_pad, hidden), const2),
        pl.BlockSpec((1, hidden), const2),
    ]
    for w, b in zip(h_ws, h_bs):
        args.append(w)
        args.append(b)
        in_specs.append(pl.BlockSpec((hidden, hidden), const2))
        in_specs.append(pl.BlockSpec((1, hidden), const2))
    args.append(w_s)
    in_specs.append(pl.BlockSpec((hidden, cls_pad), const2))

    out_specs = pl.BlockSpec((TB, cls_pad), lambda i: (i, 0))

    # Advisory cost estimate for XLA scheduling around the custom call.
    flops = 2 * B_pad * (in_pad * hidden
                         + num_hidden_layers * hidden * hidden
                         + hidden * cls_pad)
    bytes_accessed = (sum(int(a.size) * a.dtype.itemsize for a in args)
                      + B_pad * cls_pad * 4)
    cost = pl.CostEstimate(flops=flops, transcendentals=0,
                           bytes_accessed=bytes_accessed)

    # Explicit VMEM budget: resident weights + double-buffered x/out tiles +
    # f32 activations, with margin.  Capped below v7x's 64 MiB physical VMEM.
    weight_bytes = sum(int(a.size) * a.dtype.itemsize for a in args[1:])
    tile_bytes = TB * in_pad * 2 + TB * cls_pad * 4
    act_bytes = 4 * TB * max(hidden, cls_pad) * 4
    vmem_limit = min(2 * (weight_bytes + tile_bytes) + act_bytes + (8 << 20),
                     60 << 20)

    kernel = functools.partial(_mlp_kernel, num_hidden_layers)

    out = pl.pallas_call(
        kernel,
        out_shape=jax.ShapeDtypeStruct((B_pad, cls_pad), jnp.float32),
        grid=(n_tiles,),
        in_specs=in_specs,
        out_specs=out_specs,
        compiler_params=pltpu.CompilerParams(
            dimension_semantics=("parallel",),
            vmem_limit_bytes=int(vmem_limit)),
        cost_estimate=cost,
    )(*args)

    return out[:B, :num_classes]


def init_params(key, input_size, hidden_size, num_hidden_layers, num_classes):
    """Deterministic PyTorch-Linear-style uniform init (U[-1/sqrt(fan_in), +])."""
    keys = jax.random.split(key, 2 + 2 * num_hidden_layers + 1)
    ki = iter(keys)

    def linear(k, fan_in, fan_out, bias=True):
        bound = 1.0 / (fan_in ** 0.5)
        kw, kb = jax.random.split(k)
        w = jax.random.uniform(kw, (fan_in, fan_out), jnp.float32, -bound, bound)
        b = (jax.random.uniform(kb, (1, fan_out), jnp.float32, -bound, bound)
             if bias else None)
        return w, b

    w_embed, b_embed = linear(next(ki), input_size, hidden_size)
    hidden_ws, hidden_bs = [], []
    for _ in range(num_hidden_layers):
        w, b = linear(next(ki), hidden_size, hidden_size)
        hidden_ws.append(w)
        hidden_bs.append(b)
    w_score, _ = linear(next(ki), hidden_size, num_classes, bias=False)
    return w_embed, b_embed, hidden_ws, hidden_bs, w_score


def reference_forward(x, w_embed, b_embed, hidden_ws, hidden_bs, w_score):
    B = x.shape[0]
    h = x.reshape(B, -1).astype(jnp.float32) @ w_embed + b_embed
    for w, b in zip(hidden_ws, hidden_bs):
        h = jnp.maximum(h @ w + b, 0.0)
    h = jnp.maximum(h, 0.0)
    return h @ w_score


if __name__ == "__main__":
    # Small shapes consistent with the module: flatten a (2, 4, 16, 16) input
    # -> input_size = 1024, hidden_size = 32, one hidden layer, 2 classes.
    B, C, H, W = 2, 4, 16, 16
    input_size = C * H * W
    hidden_size = 32
    num_hidden_layers = 1
    num_classes = 2

    key = jax.random.PRNGKey(0)
    kx, kp = jax.random.split(key)
    x = jax.random.normal(kx, (B, C, H, W), jnp.float32)

    params = init_params(kp, input_size, hidden_size, num_hidden_layers,
                         num_classes)

    out = mlp_classifier_forward(x, *params)
    out = jax.block_until_ready(out)

    ref = reference_forward(x, *params)
    assert out.shape == (B, num_classes)
    # bf16 MXU inputs (f32 accumulation) -> relaxed tolerance vs f32 reference.
    assert jnp.allclose(out, ref, atol=3e-2, rtol=3e-2), (out, ref)

    print("KERNEL_OK")
</pallas_src>

<mosaic_0001>
module attributes {stable_mosaic.version = 11 : i64} {
  func.func @_mlp_kernel(%arg0: i32, %arg1: memref<8x1024xbf16, #tpu.memory_space<vmem>>, %arg2: memref<1024x32xbf16, #tpu.memory_space<vmem>>, %arg3: memref<1x32xf32, #tpu.memory_space<vmem>>, %arg4: memref<32x32xbf16, #tpu.memory_space<vmem>>, %arg5: memref<1x32xf32, #tpu.memory_space<vmem>>, %arg6: memref<32x128xbf16, #tpu.memory_space<vmem>>, %arg7: memref<8x128xf32, #tpu.memory_space<vmem>>) attributes {dimension_semantics = [#tpu.dimension_semantics<parallel>], iteration_bounds = array<i64: 1>, scalar_prefetch = 0 : i64, scratch_operands = 0 : i64, tpu.core_type = #tpu.core_type<tc>, window_params = [{transform_indices = @transform_0, window_bounds = array<i64: 8, 1024>}, {pipeline_mode = #tpu.pipeline_mode<synchronous>, transform_indices = @transform_1, window_bounds = array<i64: 1024, 32>}, {pipeline_mode = #tpu.pipeline_mode<synchronous>, transform_indices = @transform_2, window_bounds = array<i64: 1, 32>}, {pipeline_mode = #tpu.pipeline_mode<synchronous>, transform_indices = @transform_3, window_bounds = array<i64: 32, 32>}, {pipeline_mode = #tpu.pipeline_mode<synchronous>, transform_indices = @transform_4, window_bounds = array<i64: 1, 32>}, {pipeline_mode = #tpu.pipeline_mode<synchronous>, transform_indices = @transform_5, window_bounds = array<i64: 32, 128>}, {transform_indices = @transform_6, window_bounds = array<i64: 8, 128>}]} {
    %c0 = arith.constant 0 : index
    %c0_0 = arith.constant 0 : index
    %0 = vector.load %arg1[%c0, %c0_0] : memref<8x1024xbf16, #tpu.memory_space<vmem>>, vector<8x1024xbf16>
    %c0_1 = arith.constant 0 : index
    %c0_2 = arith.constant 0 : index
    %1 = vector.load %arg2[%c0_1, %c0_2] : memref<1024x32xbf16, #tpu.memory_space<vmem>>, vector<1024x32xbf16>
    %cst = arith.constant dense<0.000000e+00> : vector<8x32xf32>
    %2 = tpu.matmul %0, %1, %cst {dimension_numbers = #tpu.dot_dimension_numbers<[1], [0], [0], [1], [0, 0, 1, 1], [], []>} : vector<8x1024xbf16>, vector<1024x32xbf16>, vector<8x32xf32> -> vector<8x32xf32>
    %c0_3 = arith.constant 0 : index
    %c0_4 = arith.constant 0 : index
    %3 = vector.load %arg3[%c0_3, %c0_4] : memref<1x32xf32, #tpu.memory_space<vmem>>, vector<1x32xf32>
    %4 = vector.broadcast %3 : vector<1x32xf32> to vector<8x32xf32>
    %5 = arith.addf %2, %4 : vector<8x32xf32>
    %6 = arith.truncf %5 : vector<8x32xf32> to vector<8x32xbf16>
    %c0_5 = arith.constant 0 : index
    %c0_6 = arith.constant 0 : index
    %7 = vector.load %arg4[%c0_5, %c0_6] : memref<32x32xbf16, #tpu.memory_space<vmem>>, vector<32x32xbf16>
    %cst_7 = arith.constant dense<0.000000e+00> : vector<8x32xf32>
    %8 = tpu.matmul %6, %7, %cst_7 {dimension_numbers = #tpu.dot_dimension_numbers<[1], [0], [0], [1], [0, 0, 1, 1], [], []>} : vector<8x32xbf16>, vector<32x32xbf16>, vector<8x32xf32> -> vector<8x32xf32>
    %c0_8 = arith.constant 0 : index
    %c0_9 = arith.constant 0 : index
    %9 = vector.load %arg5[%c0_8, %c0_9] : memref<1x32xf32, #tpu.memory_space<vmem>>, vector<1x32xf32>
    %10 = vector.broadcast %9 : vector<1x32xf32> to vector<8x32xf32>
    %11 = arith.addf %8, %10 : vector<8x32xf32>
    %cst_10 = arith.constant 0.000000e+00 : f32
    %12 = vector.broadcast %cst_10 : f32 to vector<8x32xf32>
    %13 = arith.maximumf %11, %12 : vector<8x32xf32>
    %14 = arith.truncf %13 : vector<8x32xf32> to vector<8x32xbf16>
    %c0_11 = arith.constant 0 : index
    %c0_12 = arith.constant 0 : index
    %15 = vector.load %arg6[%c0_11, %c0_12] : memref<32x128xbf16, #tpu.memory_space<vmem>>, vector<32x128xbf16>
    %cst_13 = arith.constant dense<0.000000e+00> : vector<8x128xf32>
    %16 = tpu.matmul %14, %15, %cst_13 {dimension_numbers = #tpu.dot_dimension_numbers<[1], [0], [0], [1], [0, 0, 1, 1], [], []>} : vector<8x32xbf16>, vector<32x128xbf16>, vector<8x128xf32> -> vector<8x128xf32>
    %c0_14 = arith.constant 0 : index
    %c0_15 = arith.constant 0 : index
    %17 = vector.load %arg7[%c0_14, %c0_15] : memref<8x128xf32, #tpu.memory_space<vmem>>, vector<8x128xf32>
    tpu.vector_store %arg7[%c0_14, %c0_15], %16 {strides = array<i32>} : memref<8x128xf32, #tpu.memory_space<vmem>>, vector<8x128xf32>,
    return
  }
  func.func @transform_0(%arg0: i32) -> (i32, i32) {
    %c0_i32 = arith.constant 0 : i32
    %c0_i32_0 = arith.constant 0 : i32
    return %arg0, %c0_i32 : i32, i32
  }
  func.func @transform_1(%arg0: i32) -> (i32, i32) {
    %c0_i32 = arith.constant 0 : i32
    %c0_i32_0 = arith.constant 0 : i32
    %c0_i32_1 = arith.constant 0 : i32
    return %c0_i32, %c0_i32_0 : i32, i32
  }
  func.func @transform_2(%arg0: i32) -> (i32, i32) {
    %c0_i32 = arith.constant 0 : i32
    %c0_i32_0 = arith.constant 0 : i32
    %c0_i32_1 = arith.constant 0 : i32
    return %c0_i32, %c0_i32_0 : i32, i32
  }
  func.func @transform_3(%arg0: i32) -> (i32, i32) {
    %c0_i32 = arith.constant 0 : i32
    %c0_i32_0 = arith.constant 0 : i32
    %c0_i32_1 = arith.constant 0 : i32
    return %c0_i32, %c0_i32_0 : i32, i32
  }
  func.func @transform_4(%arg0: i32) -> (i32, i32) {
    %c0_i32 = arith.constant 0 : i32
    %c0_i32_0 = arith.constant 0 : i32
    %c0_i32_1 = arith.constant 0 : i32
    return %c0_i32, %c0_i32_0 : i32, i32
  }
  func.func @transform_5(%arg0: i32) -> (i32, i32) {
    %c0_i32 = arith.constant 0 : i32
    %c0_i32_0 = arith.constant 0 : i32
    %c0_i32_1 = arith.constant 0 : i32
    return %c0_i32, %c0_i32_0 : i32, i32
  }
  func.func @transform_6(%arg0: i32) -> (i32, i32) {
    %c0_i32 = arith.constant 0 : i32
    %c0_i32_0 = arith.constant 0 : i32
    return %arg0, %c0_i32 : i32, i32
  }
}

</mosaic_0001>

<bundles_post_ra>
// kernel: tpu_custom_call.1
= control target key start
LH: loop header
LB: loop body
LE: loop exit
PB: predicated region body
PF: predicated region fallthrough
CT: control target
= control target key end

     0   :  { %s1434_s0 = inlined_call_operand.vmem [shape: bf16[8,1024], index: 0, kind: input, shape index: {}]   ;;  %s1435_s1 = inlined_call_operand.vmem [shape: bf16[1024,32], index: 1, kind: input, shape index: {}]   ;;  %s1436_s2 = inlined_call_operand.vmem [shape: f32[1,32], index: 2, kind: input, shape index: {}]   ;;  %s1437_s3 = inlined_call_operand.vmem [shape: bf16[32,32], index: 3, kind: input, shape index: {}]   ;;  %s1438_s4 = inlined_call_operand.vmem [shape: f32[1,32], index: 4, kind: input, shape index: {}]   ;;  %s1439_s5 = inlined_call_operand.vmem [shape: bf16[32,128], index: 5, kind: input, shape index: {}]   ;;  %s1440_s6 = inlined_call_operand.hbm [shape: f32[8,128], index: 6, kind: output, shape index: {}]  }
   0x1   :  { %v1073_v0 = vld [vmem:[%s1435_s1 + $0x78] sm:$0xff]   ;;  %v1077_v4 = vld [vmem:[%s1435_s1 + $0x70] sm:$0xff]   ;;  %v1081_v8 = vld [vmem:[%s1435_s1 + $0x68] sm:$0xff]  }
   0x2   :  { %v1074_v1 = vld [vmem:[%s1435_s1 + $0xf8] sm:$0xff]   ;;  %960 = vmatprep.subr.bf16.mxu0 %v1073_v0  ;;  %v1078_v5 = vld [vmem:[%s1435_s1 + $0xf0] sm:$0xff]   ;;  %v1082_v9 = vld [vmem:[%s1435_s1 + $0xe8] sm:$0xff]  }
   0x3   :  { %v1075_v2 = vld [vmem:[%s1435_s1 + $0x38] sm:$0xff]   ;;  %982 = vmatprep.subr.bf16.mxu1 %v1074_v1  ;;  %v1079_v6 = vld [vmem:[%s1435_s1 + $0x30] sm:$0xff]   ;;  %v1083_v10 = vld [vmem:[%s1435_s1 + $0x28] sm:$0xff]  }
   0x4   :  { %v1076_v3 = vld [vmem:[%s1435_s1 + $0xb8] sm:$0xff]   ;;  %961 = vmatpush3.bf16.msra.mxu0 %v1075_v2  ;;  %v1080_v7 = vld [vmem:[%s1435_s1 + $0xb0] sm:$0xff]   ;;  %v1084_v11 = vld [vmem:[%s1435_s1 + $0xa8] sm:$0xff]  }
   0x5   :  { %983 = vmatpush3.bf16.msra.mxu1 %v1076_v3  ;;  %962 = vmatprep.subr.bf16.mxu0 %v1077_v4  ;;  %v1085_v12 = vld [vmem:[%s1435_s1 + $0x60] sm:$0xff]   ;;  %v1089_v16 = vld [vmem:[%s1435_s1 + $0x58] sm:$0xff]   ;;  %v1093_v20 = vld [vmem:[%s1435_s1 + $0x50] sm:$0xff]  }
   0x6   :  { %984 = vmatprep.subr.bf16.mxu1 %v1078_v5  ;;  %v1086_v13 = vld [vmem:[%s1435_s1 + $0xe0] sm:$0xff]   ;;  %v1090_v17 = vld [vmem:[%s1435_s1 + $0xd8] sm:$0xff]   ;;  %v1094_v21 = vld [vmem:[%s1435_s1 + $0xd0] sm:$0xff]  }
   0x7   :  { %v1087_v14 = vld [vmem:[%s1435_s1 + $0x20] sm:$0xff]   ;;  %v1091_v18 = vld [vmem:[%s1435_s1 + $0x18] sm:$0xff]   ;;  %v1095_v22 = vld [vmem:[%s1435_s1 + $0x10] sm:$0xff]  }
   0x8   :  { %963 = vmatpush3.bf16.msra.mxu0 %v1079_v6  ;;  %v1088_v15 = vld [vmem:[%s1435_s1 + $0xa0] sm:$0xff]   ;;  %v1092_v19 = vld [vmem:[%s1435_s1 + $0x98] sm:$0xff]   ;;  %v1096_v23 = vld [vmem:[%s1435_s1 + $0x90] sm:$0xff]  }
   0x9   :  { %985 = vmatpush3.bf16.msra.mxu1 %v1080_v7  ;;  %964 = vmatprep.subr.bf16.mxu0 %v1081_v8  ;;  %v1097_v24 = vld [vmem:[%s1435_s1 + $0x48] sm:$0xff]   ;;  %v1101_v28 = vld [vmem:[%s1435_s1 + $0x40] sm:$0xff]   ;;  %v1109_v38 = vld [vmem:[%s1435_s1 + $0x178] sm:$0xff]  }
   0xa   :  { %986 = vmatprep.subr.bf16.mxu1 %v1082_v9  ;;  %v1098_v25 = vld [vmem:[%s1435_s1 + $0xc8] sm:$0xff]   ;;  %v1102_v29 = vld [vmem:[%s1435_s1 + $0xc0] sm:$0xff]   ;;  %v1110_v39 = vld [vmem:[%s1435_s1 + $0x1f8] sm:$0xff]  }
   0xb   :  { %v1099_v26 = vld [vmem:[%s1435_s1 + $0x8] sm:$0xff]   ;;  %v1103_v30 = vld [vmem:[%s1435_s1] sm:$0xff]   ;;  %v1111_v40 = vld [vmem:[%s1435_s1 + $0x138] sm:$0xff]  }
   0xc   :  { %965 = vmatpush3.bf16.msra.mxu0 %v1083_v10  ;;  %v1100_v27 = vld [vmem:[%s1435_s1 + $0x88] sm:$0xff]   ;;  %v1104_v31 = vld [vmem:[%s1435_s1 + $0x80] sm:$0xff]   ;;  %v1112_v41 = vld [vmem:[%s1435_s1 + $0x1b8] sm:$0xff]  }
   0xd   :  { %987 = vmatpush3.bf16.msra.mxu1 %v1084_v11  ;;  %966 = vmatprep.subr.bf16.mxu0 %v1085_v12  ;;  %v25_v32 = vld [vmem:[%s1434_s0] sm:$0xff]  ;;  %v26_v33 = vld [vmem:[%s1434_s0 + $0x8] sm:$0xff]  ;;  %v1113_v42 = vld [vmem:[%s1435_s1 + $0x170] sm:$0xff]  }
   0xe   :  { %988 = vmatprep.subr.bf16.mxu1 %v1086_v13  ;;  %v881_v34 = vcombine.low %v25_v32, %v25_v32  ;;  %v882_v35 = vcombine.high %v25_v32, %v25_v32  ;;  %v883_v36 = vcombine.low %v26_v33, %v26_v33  ;;  %v884_v37 = vcombine.high %v26_v33, %v26_v33  ;;  %v1114_v43 = vld [vmem:[%s1435_s1 + $0x1f0] sm:$0xff]   ;;  %v1117_v46 = vld [vmem:[%s1435_s1 + $0x168] sm:$0xff]   ;;  %v1121_v50 = vld [vmem:[%s1435_s1 + $0x160] sm:$0xff]  }
   0xf   :  { %v1115_v44 = vld [vmem:[%s1435_s1 + $0x130] sm:$0xff]   ;;  %v1118_v47 = vld [vmem:[%s1435_s1 + $0x1e8] sm:$0xff]   ;;  %v1122_v51 = vld [vmem:[%s1435_s1 + $0x1e0] sm:$0xff]  }
  0x10   :  { %967 = vmatpush3.bf16.msra.mxu0 %v1087_v14  ;;  %608 = vmatprep.mubr.bf16.mxu0 %v882_v35  ;;  %v1116_v45 = vld [vmem:[%s1435_s1 + $0x1b0] sm:$0xff]   ;;  %v1119_v48 = vld [vmem:[%s1435_s1 + $0x128] sm:$0xff]   ;;  %v1123_v52 = vld [vmem:[%s1435_s1 + $0x120] sm:$0xff]  }
  0x11   :  { %989 = vmatpush3.bf16.msra.mxu1 %v1088_v15  ;;  %968 = vmatprep.subr.bf16.mxu0 %v1089_v16  ;;  %v1120_v49 = vld [vmem:[%s1435_s1 + $0x1a8] sm:$0xff]   ;;  %v1124_v53 = vld [vmem:[%s1435_s1 + $0x1a0] sm:$0xff]   ;;  %v1125_v54 = vld [vmem:[%s1435_s1 + $0x158] sm:$0xff]  }
  0x12   :  { %990 = vmatprep.subr.bf16.mxu1 %v1090_v17  ;;  %648 = vmatprep.mubr.bf16.mxu1 %v884_v37  ;;  %v1126_v55 = vld [vmem:[%s1435_s1 + $0x1d8] sm:$0xff]   ;;  %v1129_v58 = vld [vmem:[%s1435_s1 + $0x150] sm:$0xff]   ;;  %v1133_v62 = vld [vmem:[%s1435_s1 + $0x148] sm:$0xff]  }
  0x13   :  { %v1127_v56 = vld [vmem:[%s1435_s1 + $0x118] sm:$0xff]   ;;  %v1130_v59 = vld [vmem:[%s1435_s1 + $0x1d0] sm:$0xff]   ;;  %v1134_v63 = vld [vmem:[%s1435_s1 + $0x1c8] sm:$0xff]  }
  0x14   :  { %969 = vmatpush3.bf16.msra.mxu0 %v1091_v18  ;;  %v1128_v57 = vld [vmem:[%s1435_s1 + $0x198] sm:$0xff]   ;;  %v1131_v60 = vld [vmem:[%s1435_s1 + $0x110] sm:$0xff]   ;;  %v1135_v0 = vld [vmem:[%s1435_s1 + $0x108] sm:$0xff]  }
  0x15   :  { %991 = vmatpush3.bf16.msra.mxu1 %v1092_v19  ;;  %970 = vmatprep.subr.bf16.mxu0 %v1093_v20  ;;  %v1132_v61 = vld [vmem:[%s1435_s1 + $0x190] sm:$0xff]   ;;  %v1136_v1 = vld [vmem:[%s1435_s1 + $0x188] sm:$0xff]   ;;  %v1137_v2 = vld [vmem:[%s1435_s1 + $0x140] sm:$0xff]  }
  0x16   :  { %992 = vmatprep.subr.bf16.mxu1 %v1094_v21  ;;  %v1138_v3 = vld [vmem:[%s1435_s1 + $0x1c0] sm:$0xff]   ;;  %v27_v6 = vld [vmem:[%s1434_s0 + $0x10] sm:$0xff]  ;;  %v28_v9 = vld [vmem:[%s1434_s0 + $0x18] sm:$0xff] }
  0x17   :  { %v1139_v4 = vld [vmem:[%s1435_s1 + $0x100] sm:$0xff]   ;;  %v885_v7 = vcombine.low %v27_v6, %v27_v6  ;;  %v886_v8 = vcombine.high %v27_v6, %v27_v6  ;;  %v887_v10 = vcombine.low %v28_v9, %v28_v9  ;;  %v888_v11 = vcombine.high %v28_v9, %v28_v9 }
  0x18   :  { %971 = vmatpush3.bf16.msra.mxu0 %v1095_v22  ;;  %v1140_v5 = vld [vmem:[%s1435_s1 + $0x180] sm:$0xff]  }
  0x19   :  { %993 = vmatpush3.bf16.msra.mxu1 %v1096_v23  ;;  %972 = vmatprep.subr.bf16.mxu0 %v1097_v24 }
  0x1a   :  { %994 = vmatprep.subr.bf16.mxu1 %v1098_v25 }
  0x1c   :  { %973 = vmatpush3.bf16.msra.mxu0 %v1099_v26 }
  0x1d   :  { %995 = vmatpush3.bf16.msra.mxu1 %v1100_v27  ;;  %974 = vmatprep.subr.bf16.mxu0 %v1101_v28 }
  0x1e   :  { %996 = vmatprep.subr.bf16.mxu1 %v1102_v29 }
  0x20   :  { %975 = vmatpush3.bf16.msra.mxu0 %v1103_v30 }
  0x21   :  { %997 = vmatpush3.bf16.msra.mxu1 %v1104_v31  ;;  %1004 = vmatprep.subr.bf16.mxu0 %v1109_v38 }
  0x22   :  { %1026 = vmatprep.subr.bf16.mxu1 %v1110_v39 }
  0x23   :  { %609 = vmatmul.mubr.bf16.vlgmr.msra.gmra.mxu0 %v881_v34 }
  0x24   :  { %649 = vmatmul.mubr.bf16.vlgmr.msra.gmra.mxu1 %v883_v36  ;;  %1005 = vmatpush3.bf16.msra.mxu0 %v1111_v40 }
  0x25   :  { %1027 = vmatpush3.bf16.msra.mxu1 %v1112_v41  ;;  %1006 = vmatprep.subr.bf16.mxu0 %v1113_v42 }
  0x26   :  { %1028 = vmatprep.subr.bf16.mxu1 %v1114_v43  ;;  %688 = vmatprep.mubr.bf16.mxu0 %v886_v8 }
  0x27   :  { %728 = vmatprep.mubr.bf16.mxu1 %v888_v11 }
  0x28   :  { %1007 = vmatpush3.bf16.msra.mxu0 %v1115_v44 }
  0x29   :  { %1029 = vmatpush3.bf16.msra.mxu1 %v1116_v45  ;;  %1008 = vmatprep.subr.bf16.mxu0 %v1117_v46 }
  0x2a   :  { %1030 = vmatprep.subr.bf16.mxu1 %v1118_v47 }
  0x2c   :  { %1009 = vmatpush3.bf16.msra.mxu0 %v1119_v48 }
  0x2d   :  { %1031 = vmatpush3.bf16.msra.mxu1 %v1120_v49  ;;  %1010 = vmatprep.subr.bf16.mxu0 %v1121_v50 }
  0x2e   :  { %1032 = vmatprep.subr.bf16.mxu1 %v1122_v51 }
  0x30   :  { %1011 = vmatpush3.bf16.msra.mxu0 %v1123_v52 }
  0x31   :  { %1033 = vmatpush3.bf16.msra.mxu1 %v1124_v53  ;;  %1012 = vmatprep.subr.bf16.mxu0 %v1125_v54 }
  0x32   :  { %1034 = vmatprep.subr.bf16.mxu1 %v1126_v55 }
  0x34   :  { %1013 = vmatpush3.bf16.msra.mxu0 %v1127_v56 }
  0x35   :  { %1035 = vmatpush3.bf16.msra.mxu1 %v1128_v57  ;;  %1014 = vmatprep.subr.bf16.mxu0 %v1129_v58 }
  0x36   :  { %1036 = vmatprep.subr.bf16.mxu1 %v1130_v59 }
  0x38   :  { %1015 = vmatpush3.bf16.msra.mxu0 %v1131_v60 }
  0x39   :  { %1037 = vmatpush3.bf16.msra.mxu1 %v1132_v61  ;;  %1016 = vmatprep.subr.bf16.mxu0 %v1133_v62 }
  0x3a   :  { %1038 = vmatprep.subr.bf16.mxu1 %v1134_v63 }
  0x3c   :  { %1017 = vmatpush3.bf16.msra.mxu0 %v1135_v0 }
  0x3d   :  { %1039 = vmatpush3.bf16.msra.mxu1 %v1136_v1  ;;  %1018 = vmatprep.subr.bf16.mxu0 %v1137_v2 }
  0x3e   :  { %1040 = vmatprep.subr.bf16.mxu1 %v1138_v3 }
  0x40   :  { %1019 = vmatpush3.bf16.msra.mxu0 %v1139_v4 }
  0x41   :  { %1041 = vmatpush3.bf16.msra.mxu1 %v1140_v5 }
  0x42   :  { %11 = vsyncpa [#allocation3], 0  ;;  %v1145_v12 = vld [vmem:[%s1437_s3 + $0x8] sm:$0xff]   ;;  %v1171_v13 = vmov 0.0   ;;  %v1146_v14 = vld [vmem:[%s1437_s3] sm:$0xff]   ;;  %vm1172_vm0 = vmmov 0  }
  0x43   :  { %689 = vmatmul.mubr.bf16.vlgmr.msra.gmra.mxu0 %v885_v7  ;;  %1054 = vmatprep.subr.bf16.mxu0 %v1171_v13  ;;  %v1147_v15 = vld [vmem:[%s1439_s5 + $0x8] sm:$0xff]   ;;  %v880_v25 = vld [vmem:[%s1436_s2] ss:$0 sm:$0xff]  ;;  %vm760_vm1 = vcmask 261120   ;;  %s1173_s21 = smov [#allocation2]  }
  0x44   :  { %729 = vmatmul.mubr.bf16.vlgmr.msra.gmra.mxu1 %v887_v10  ;;  %1062 = vmatprep.subr.bf16.mxu1 %v1171_v13  ;;  %v1148_v42 = vld [vmem:[%s1439_s5] sm:$0xff]   ;;  %s872_s22 = sshll.u32 %s1173_s21, 4  ;;  %s873_s22 = int_to_ptr.vmem [resolvable:$true] %s872_s22 }
  0x45   :  { %1055 = vmatpush3.bf16.msra.mxu0 %v1145_v12  ;;  %1058 = vmatprep.mubr.msk.bf16.mxu0 %vm1172_vm0, %v1171_v13  ;;  %v953_v43 = vld [vmem:[%s1438_s4] ss:$0 sm:$0xff]  ;;  %s1149_s5 = scalar_lea.vmem %s873_s22, 128  ;;  %p1154_p1 = scmp.lt.s32.totalorder %s873_s22, %s873_s22 }
  0x46   :  { %1056 = vmatprep.subr.bf16.mxu0 %v1171_v13  ;;  %1066 = vmatprep.mubr.msk.bf16.mxu1 %vm1172_vm0, %v1171_v13  ;;  %p1150_p0 = scmp.ne.s32.totalorder %s873_s22, %s1149_s5  ;;  %p1155_p2 = scmp.lt.s32.totalorder %s1149_s5, %s1149_s5 }
  0x47   :  { %1063 = vmatpush3.bf16.msra.mxu1 %v1147_v15 }
  0x48   :  { %1064 = vmatprep.subr.bf16.mxu1 %v1171_v13  ;;  %p1156_p3 = por %p1155_p2, %p1154_p1 }
  0x49   :  { %1057 = vmatpush3.bf16.msra.mxu0 %v1146_v14 }
  0x4a   :  { %p1157_p4 = pnand %p1156_p3, %p1150_p0 }
  0x4b   :  { %1065 = vmatpush3.bf16.msra.mxu1 %v1148_v42 }
  0xe3   :  { %v976_v16 = vpop.f32.mrf.mxu0 }
  0xe4   :  { %v998_v17 = vpop.f32.mrf.mxu1 }
  0xe5   :  { %v977_v18 = vpop.f32.mrf.mxu0 }
  0xe6   :  { %v999_v19 = vpop.f32.mrf.mxu1  ;;  %v978_v24 = vadd.f32 %v977_v18, %v976_v16 }
  0xe7   :  { %v979_v20 = vpop.f32.mrf.mxu0  ;;  %v1000_v27 = vadd.f32 %v999_v19, %v998_v17 }
  0xe8   :  { %v1001_v21 = vpop.f32.mrf.mxu1  ;;  %v611_v26 = vadd.f32 %v978_v24, %v880_v25 }
  0xe9   :  { %v980_v22 = vpop.f32.mrf.mxu0 }
  0xea   :  { %v1002_v23 = vpop.f32.mrf.mxu1  ;;  %v651_v32 = vadd.f32 %v1000_v27, %v611_v26 }
 0x103   :  { %v1020_v28 = vpop.f32.mrf.mxu0 }
 0x104   :  { %v1042_v29 = vpop.f32.mrf.mxu1 }
 0x105   :  { %v1021_v30 = vpop.f32.mrf.mxu0 }
 0x106   :  { %v1043_v31 = vpop.f32.mrf.mxu1  ;;  %v1022_v33 = vadd.f32 %v1021_v30, %v1020_v28 }
 0x107   :  { %v1023_v34 = vpop.f32.mrf.mxu0  ;;  %v1044_v37 = vadd.f32 %v1043_v31, %v1042_v29 }
 0x108   :  { %v1045_v35 = vpop.f32.mrf.mxu1  ;;  %v691_v36 = vadd.f32 %v1022_v33, %v651_v32 }
 0x109   :  { %v1024_v38 = vpop.f32.mrf.mxu0 }
 0x10a   :  { %v1046_v39 = vpop.f32.mrf.mxu1  ;;  %v731_v40 = vadd.f32 %v1044_v37, %v691_v36 }
 0x10c   :  { %v736_v41 = vpack.c.bf16 %v731_v40, %v731_v40 }
 0x10e   :  { %1059 = vmatmul.mubr.msk.bf16.vlgmr.msra.gmra.mxu0 %vm760_vm1, %v736_v41 }
 0x1ce   :  { %v798_v44 = vpop.f32.mrf.mxu0 }
 0x1cf   :  { %v799_v45 = vadd.f32 %v953_v43, %v798_v44 }
 0x1d0   :  { %v1060_v46 = vpop.f32.mrf.mxu0 }
 0x1d1   :  { %v804_v47 = vmax.f32 %v799_v45, 0.0 }
 0x1d2   :  { %v801_v48 = vpop.f32.mrf.mxu0 }
 0x1d3   :  { %v805_v49 = vpack.c.bf16 %v804_v47, %v804_v47 }
 0x1d4   :  { %v1061_v50 = vpop.f32.mrf.mxu0 }
 0x1d5   :  { %1067 = vmatmul.mubr.msk.bf16.vlgmr.msra.gmra.mxu1 %vm760_vm1, %v805_v49 }
 0x295   :  { %v859_v51 = vpop.f32.mrf.mxu1 }
 0x296   :  { %865 = vst [vmem:[#allocation2] sm:$0xff] %v859_v51 }
 0x297   :  { %v1068_v52 = vpop.f32.mrf.mxu1 }
 0x298   :  { %1160 = shalt.err (!%p1157_p4)
}
 0x299   :  { %875 = dma.vmem_to_hbm [thread:$0]  %s873_s22, 128, %s1440_s6, [#allocation3]   ;;  %v862_v53 = vpop.f32.mrf.mxu1 }
 0x29b   :  { %v1069_v54 = vpop.f32.mrf.mxu1 }
 0x29c   :  { %1169 = dma.done.wait [#allocation3], 128  }
 0x29d   :  { %1170 = vsyncadd [#allocation3], 4294967168 }
 0x29e   :  { %879 = vsyncpa [#allocation3], 1 }

</bundles_post_ra>
